<compile_context>
chip_gen: v7x
topology: tpu7x:2x2x1
jax: 0.10.0
libtpu: 0.0.40
codegen_flags: <defaults>
</compile_context>

<pallas_src>
import functools

import numpy as np

import jax
import jax.numpy as jnp
from jax import lax
from jax.experimental import pallas as pl
from jax.experimental.pallas import tpu as pltpu


def _wbce_kernel(yp_ref, yt_ref, w0_ref, w1_ref, wm_ref, acc_ref, *,
                 L, tile_l, tiles_per_split, weigh_with_matrix_sum):
    """Accumulate per-position partials into the resident output block.

    yp_ref / yt_ref : (B*C, tile_l) VMEM tiles of predictions / targets.
    w0_ref / w1_ref : (B*C, 1) per-row class weights (row = b*C + c).
    wm_ref          : (B*C, 1) mask selecting the weight-map rows (c == C-1).
    acc_ref         : (1, 2, tile_l) output block, resident across the inner
                      (reduction) grid axis.  Row 0 accumulates
                      W_sum[l] * (-T_sum[l]); row 1 accumulates W_sum[l].
    """
    p = pl.program_id(0)   # core split (parallel)
    i = pl.program_id(1)   # tile within split (reduction, arbitrary)

    @pl.when(i == 0)
    def _():
        acc_ref[...] = jnp.zeros_like(acc_ref)

    eps = 1e-07
    yp = jnp.clip(yp_ref[...].astype(jnp.float32), eps, 1.0 - eps)   # (BC, TL)
    yt = yt_ref[...].astype(jnp.float32)                             # (BC, TL)
    w0 = w0_ref[...]                                                 # (BC, 1)
    w1 = w1_ref[...]                                                 # (BC, 1)
    wm = wm_ref[...]                                                 # (BC, 1)

    lp = jnp.log(yp)                                                 # EUP
    lq = jnp.log(1.0 - yp)                                           # EUP
    # s = -(BCE term); the minus sign is folded into the wrapper's final scale.
    s = yt * (w1 * lp - w0 * lq) + w0 * lq                           # (BC, TL)

    t_sum = jnp.sum(s, axis=0, keepdims=True)          # (1, TL) sum over batch*chan
    w_sum = jnp.sum(wm * yt, axis=0, keepdims=True)    # (1, TL) sum over batch of w

    # Lane-validity mask: covers (a) the ragged last tile (tile_l need not
    # divide L) and (b) phantom tiles of the 2-way split whose block index was
    # clamped in the index_map.  Also neutralizes NaN/garbage from OOB reads.
    t_idx = p * tiles_per_split + i
    offs = t_idx * tile_l + lax.broadcasted_iota(jnp.int32, (1, tile_l), 1)
    valid = offs < L
    t_sum = jnp.where(valid, t_sum, 0.0)
    w_sum = jnp.where(valid, w_sum, 0.0)

    acc_ref[0:1, 0:1, :] = acc_ref[0:1, 0:1, :] + (t_sum * w_sum)[None]
    if weigh_with_matrix_sum:                          # static (trace-time) flag
        acc_ref[0:1, 1:2, :] = acc_ref[0:1, 1:2, :] + w_sum[None]


def _rows_padded(nrows, itemsize):
    """VMEM sublane padding: rows round up to 8 (f32) / 16 (bf16) / 32 (int8)."""
    h = 8 * max(1, 4 // int(itemsize))
    return -(-nrows // h) * h


def weight_matrix_weighted_bce(y_pred, y_true, class_weights,
                               weigh_with_matrix_sum=False,
                               vmem_block_budget_bytes=32 * 1024 * 1024,
                               vmem_limit_bytes=48 * 1024 * 1024):
    """Pallas implementation of WeightMatrixWeightedBCE.forward (NCHW inputs).

    y_true may be bfloat16 (labels / weight map) to cut HBM traffic; y_pred
    should stay float32 (bf16 rounding near 1.0 breaks log(1 - yp)).
    """
    assert y_pred.shape == y_true.shape
    B, C = y_pred.shape[0], y_pred.shape[1]
    assert len(class_weights) == C, \
        "Class weight sets and number of channels have to match!"
    L = 1
    for d in y_pred.shape[2:]:
        L *= d
    BC = B * C

    # Fold (B, C) into one 8-alignable sublane dimension; row = b*C + c.
    yp = y_pred.reshape(BC, L)
    yt = y_true.reshape(BC, L)

    # Per-row class weights and weight-row mask, passed as tiny VMEM inputs
    # (cannot be baked in: Pallas kernels may not capture array constants).
    w0_np = np.asarray([cw[0] for cw in class_weights], np.float32)
    w1_np = np.asarray([cw[1] for cw in class_weights], np.float32)
    m_np = np.zeros((C,), np.float32)
    m_np[C - 1] = 1.0
    w0r = jnp.asarray(np.tile(w0_np, B)[:, None])   # (BC, 1)
    w1r = jnp.asarray(np.tile(w1_np, B)[:, None])   # (BC, 1)
    wmr = jnp.asarray(np.tile(m_np, B)[:, None])    # (BC, 1)

    # VMEM budget (sublane-padding aware): 2 pipeline buffers per big input
    # plus the (8-row padded, double-buffered) f32 accumulator block.
    bytes_per_lane = 0
    for a in (yp, yt):
        isz = jnp.dtype(a.dtype).itemsize
        bytes_per_lane += 2 * _rows_padded(BC, isz) * isz
    bytes_per_lane += 2 * 8 * 4

    L128 = -(-L // 128) * 128
    cap_l = max(128, (int(vmem_block_budget_bytes) // max(bytes_per_lane, 1))
                // 128 * 128)
    tile_l = min(L128, cap_l)                 # largest 128-multiple tile in budget

    num_tiles = -(-L // tile_l)
    # Always split the tile range 2 ways (v7x megacore); no-op loop on 1-TC chips.
    num_splits = 2 if num_tiles >= 2 else 1
    tps = -(-num_tiles // num_splits)

    kernel = functools.partial(
        _wbce_kernel, L=L, tile_l=tile_l, tiles_per_split=tps,
        weigh_with_matrix_sum=bool(weigh_with_matrix_sum))

    def big_idx(p, i):
        # Clamp so odd tile counts never produce an OOB block start; the
        # phantom (duplicated) tile is fully masked out inside the kernel.
        return (0, jnp.minimum(p * tps + i, num_tiles - 1))

    small_idx = lambda p, i: (0, 0)

    out = pl.pallas_call(
        kernel,
        out_shape=jax.ShapeDtypeStruct((num_splits, 2, tile_l), jnp.float32),
        grid_spec=pltpu.PrefetchScalarGridSpec(
            num_scalar_prefetch=0,
            grid=(num_splits, tps),
            in_specs=[
                pl.BlockSpec((BC, tile_l), big_idx),
                pl.BlockSpec((BC, tile_l), big_idx),
                pl.BlockSpec((BC, 1), small_idx),
                pl.BlockSpec((BC, 1), small_idx),
                pl.BlockSpec((BC, 1), small_idx),
            ],
            out_specs=pl.BlockSpec((1, 2, tile_l), lambda p, i: (p, 0, 0)),
        ),
        compiler_params=pltpu.CompilerParams(
            # TODO(synk): consider pltpu.CORE_PARALLEL for the leading axis on
            # v7x once verified against the lowering on that generation.
            dimension_semantics=("parallel", "arbitrary"),
            vmem_limit_bytes=int(vmem_limit_bytes)),
    )(yp, yt, w0r, w1r, wmr)

    # Final tiny collapse (lane + split sums and scalar scaling) in XLA.
    # Kernel accumulated -(T_sum); negate here.
    res = -jnp.sum(out[:, 0, :]) / jnp.float32(B * B * L)
    if weigh_with_matrix_sum:
        # extra scalar factor sum(w) / w.nelement()  (w has B*L elements)
        res = res * (jnp.sum(out[:, 1, :]) / jnp.float32(B * L))
    return res


def reference(y_pred, y_true, cw, weigh_with_matrix_sum=False):
    """Pure-JAX transcription of the PyTorch forward (incl. its broadcasting)."""
    eps = 1e-07
    yp = jnp.clip(y_pred, eps, 1.0 - eps)
    w = y_true[:, -1][:, None]            # (B, 1, H, W)
    C = y_pred.shape[1]
    loss = 0.0
    for c in range(C):
        term = -(cw[c][1] * y_true[:, c] * jnp.log(yp[:, c])
                 + cw[c][0] * (1.0 - y_true[:, c]) * jnp.log(1.0 - yp[:, c]))
        contrib = w * term                # broadcasts to (B, B, H, W), as in torch
        if weigh_with_matrix_sum:
            contrib = (jnp.sum(w) / w.size) * contrib
        loss = loss + contrib
    return jnp.mean(loss)


if __name__ == "__main__":
    key = jax.random.PRNGKey(0)
    k1, k2, k3, k4, k5, k6 = jax.random.split(key, 6)

    # Case 1: canonical shape (L multiple of 128, B*C == 8), both flag settings.
    B, C, H, W = 2, 4, 16, 16
    class_weights = [[0.5, 2.0], [1.0, 1.0], [0.3, 3.0], [0.8, 1.5]]
    y_pred = jax.nn.sigmoid(jax.random.normal(k1, (B, C, H, W), jnp.float32))
    y_true = (jax.random.uniform(k2, (B, C, H, W)) > 0.5).astype(jnp.float32)

    out = jax.block_until_ready(
        weight_matrix_weighted_bce(y_pred, y_true, class_weights))
    ref = reference(y_pred, y_true, class_weights)
    assert jnp.allclose(out, ref, rtol=1e-4, atol=1e-5), (out, ref)

    out2 = jax.block_until_ready(
        weight_matrix_weighted_bce(y_pred, y_true, class_weights,
                                   weigh_with_matrix_sum=True))
    ref2 = reference(y_pred, y_true, class_weights, weigh_with_matrix_sum=True)
    assert jnp.allclose(out2, ref2, rtol=1e-4, atol=1e-5), (out2, ref2)

    # Case 2: spatial size not a multiple of 128 AND B*C == 6 (not 8):
    # exercises the in-kernel ragged-tail lane mask (no jnp.pad path anymore).
    B2, C2, H2, W2 = 2, 3, 10, 10
    cw2 = [[0.5, 2.0], [1.0, 1.0], [0.3, 3.0]]
    yp2 = jax.nn.sigmoid(jax.random.normal(k3, (B2, C2, H2, W2), jnp.float32))
    yt2 = (jax.random.uniform(k4, (B2, C2, H2, W2)) > 0.5).astype(jnp.float32)
    out3 = jax.block_until_ready(weight_matrix_weighted_bce(yp2, yt2, cw2))
    ref3 = reference(yp2, yt2, cw2)
    assert jnp.allclose(out3, ref3, rtol=1e-4, atol=1e-5), (out3, ref3)

    # Case 3: bf16 y_true (bandwidth path) + tiny VMEM block budget to force a
    # multi-tile grid, the 2-way split, and an odd tile count (phantom tile).
    B3, C3, H3, W3 = 2, 4, 34, 34
    yp3 = jax.nn.sigmoid(jax.random.normal(k5, (B3, C3, H3, W3), jnp.float32))
    yt3_f32 = (jax.random.uniform(k6, (B3, C3, H3, W3)) > 0.5).astype(jnp.float32)
    yt3 = yt3_f32.astype(jnp.bfloat16)          # exact for 0/1 labels / weights
    out4 = jax.block_until_ready(
        weight_matrix_weighted_bce(yp3, yt3, class_weights,
                                   weigh_with_matrix_sum=True,
                                   vmem_block_budget_bytes=64 * 1024))
    ref4 = reference(yp3, yt3_f32, class_weights, weigh_with_matrix_sum=True)
    assert jnp.allclose(out4, ref4, rtol=1e-4, atol=1e-5), (out4, ref4)

    print("KERNEL_OK")
</pallas_src>

<mosaic_0001>
module attributes {stable_mosaic.version = 11 : i64} {
  func.func @_wbce_kernel(%arg0: i32, %arg1: i32, %arg2: memref<8x256xf32, #tpu.memory_space<vmem>>, %arg3: memref<8x256xf32, #tpu.memory_space<vmem>>, %arg4: memref<8x1xf32, #tpu.memory_space<vmem>>, %arg5: memref<8x1xf32, #tpu.memory_space<vmem>>, %arg6: memref<8x1xf32, #tpu.memory_space<vmem>>, %arg7: memref<1x2x256xf32, #tpu.memory_space<vmem>>) attributes {dimension_semantics = [#tpu.dimension_semantics<parallel>, #tpu.dimension_semantics<arbitrary>], iteration_bounds = array<i64: 1, 1>, scalar_prefetch = 0 : i64, scratch_operands = 0 : i64, tpu.core_type = #tpu.core_type<tc>, window_params = [{transform_indices = @transform_0, window_bounds = array<i64: 8, 256>}, {transform_indices = @transform_1, window_bounds = array<i64: 8, 256>}, {pipeline_mode = #tpu.pipeline_mode<synchronous>, transform_indices = @transform_2, window_bounds = array<i64: 8, 1>}, {pipeline_mode = #tpu.pipeline_mode<synchronous>, transform_indices = @transform_3, window_bounds = array<i64: 8, 1>}, {pipeline_mode = #tpu.pipeline_mode<synchronous>, transform_indices = @transform_4, window_bounds = array<i64: 8, 1>}, {transform_indices = @transform_5, window_bounds = array<i64: 1, 2, 256>}]} {
    %c0_i32 = arith.constant 0 : i32
    %0 = arith.cmpi eq, %arg1, %c0_i32 : i32
    %1 = arith.extui %0 : i1 to i32
    %c0_i32_0 = arith.constant 0 : i32
    %2 = arith.cmpi ne, %1, %c0_i32_0 : i32
    scf.if %2 {
      %cst_23 = arith.constant 0.000000e+00 : f32
      %48 = vector.broadcast %cst_23 : f32 to vector<1x2x256xf32>
      %c0_24 = arith.constant 0 : index
      %c0_25 = arith.constant 0 : index
      %c0_26 = arith.constant 0 : index
      %49 = vector.load %arg7[%c0_24, %c0_25, %c0_26] : memref<1x2x256xf32, #tpu.memory_space<vmem>>, vector<1x2x256xf32>
      tpu.vector_store %arg7[%c0_24, %c0_25, %c0_26], %48 {strides = array<i32>} : memref<1x2x256xf32, #tpu.memory_space<vmem>>, vector<1x2x256xf32>,
    } else {
    }
    %c0 = arith.constant 0 : index
    %c0_1 = arith.constant 0 : index
    %3 = vector.load %arg2[%c0, %c0_1] : memref<8x256xf32, #tpu.memory_space<vmem>>, vector<8x256xf32>
    %cst = arith.constant 1.000000e-07 : f32
    %cst_2 = arith.constant 0.99999988 : f32
    %4 = vector.broadcast %cst : f32 to vector<8x256xf32>
    %5 = arith.maximumf %4, %3 : vector<8x256xf32>
    %6 = vector.broadcast %cst_2 : f32 to vector<8x256xf32>
    %7 = arith.minimumf %6, %5 : vector<8x256xf32>
    %c0_3 = arith.constant 0 : index
    %c0_4 = arith.constant 0 : index
    %8 = vector.load %arg3[%c0_3, %c0_4] : memref<8x256xf32, #tpu.memory_space<vmem>>, vector<8x256xf32>
    %c0_5 = arith.constant 0 : index
    %c0_6 = arith.constant 0 : index
    %9 = vector.load %arg4[%c0_5, %c0_6] : memref<8x1xf32, #tpu.memory_space<vmem>>, vector<8x1xf32>
    %c0_7 = arith.constant 0 : index
    %c0_8 = arith.constant 0 : index
    %10 = vector.load %arg5[%c0_7, %c0_8] : memref<8x1xf32, #tpu.memory_space<vmem>>, vector<8x1xf32>
    %c0_9 = arith.constant 0 : index
    %c0_10 = arith.constant 0 : index
    %11 = vector.load %arg6[%c0_9, %c0_10] : memref<8x1xf32, #tpu.memory_space<vmem>>, vector<8x1xf32>
    %12 = math.log %7 : vector<8x256xf32>
    %cst_11 = arith.constant 1.000000e+00 : f32
    %13 = vector.broadcast %cst_11 : f32 to vector<8x256xf32>
    %14 = arith.subf %13, %7 : vector<8x256xf32>
    %15 = math.log %14 : vector<8x256xf32>
    %16 = vector.broadcast %10 : vector<8x1xf32> to vector<8x256xf32>
    %17 = arith.mulf %16, %12 : vector<8x256xf32>
    %18 = vector.broadcast %9 : vector<8x1xf32> to vector<8x256xf32>
    %19 = arith.mulf %18, %15 : vector<8x256xf32>
    %20 = arith.subf %17, %19 : vector<8x256xf32>
    %21 = arith.mulf %8, %20 : vector<8x256xf32>
    %22 = vector.broadcast %9 : vector<8x1xf32> to vector<8x256xf32>
    %23 = arith.mulf %22, %15 : vector<8x256xf32>
    %24 = arith.addf %21, %23 : vector<8x256xf32>
    %cst_12 = arith.constant dense<0.000000e+00> : vector<256xf32>
    %25 = vector.multi_reduction <add>, %24, %cst_12 [0] : vector<8x256xf32> to vector<256xf32>
    %26 = vector.shape_cast %25 : vector<256xf32> to vector<1x256xf32>
    %27 = vector.broadcast %11 : vector<8x1xf32> to vector<8x256xf32>
    %28 = arith.mulf %27, %8 : vector<8x256xf32>
    %cst_13 = arith.constant dense<0.000000e+00> : vector<256xf32>
    %29 = vector.multi_reduction <add>, %28, %cst_13 [0] : vector<8x256xf32> to vector<256xf32>
    %30 = vector.shape_cast %29 : vector<256xf32> to vector<1x256xf32>
    %c1_i32 = arith.constant 1 : i32
    %31 = arith.muli %arg0, %c1_i32 : i32
    %32 = arith.addi %31, %arg1 : i32
    %c256_i32 = arith.constant 256 : i32
    %33 = arith.muli %32, %c256_i32 : i32
    %34 = tpu.iota {dimensions = array<i32: 1>} : vector<1x256xi32>
    %35 = vector.broadcast %33 : i32 to vector<1x256xi32>
    %36 = arith.addi %35, %34 : vector<1x256xi32>
    %c256_i32_14 = arith.constant 256 : i32
    %37 = vector.broadcast %c256_i32_14 : i32 to vector<1x256xi32>
    %38 = arith.cmpi slt, %36, %37 : vector<1x256xi32>
    %cst_15 = arith.constant 0.000000e+00 : f32
    %39 = vector.broadcast %cst_15 : f32 to vector<1x256xf32>
    %40 = arith.select %38, %26, %39 : vector<1x256xi1>, vector<1x256xf32>
    %cst_16 = arith.constant 0.000000e+00 : f32
    %41 = vector.broadcast %cst_16 : f32 to vector<1x256xf32>
    %42 = arith.select %38, %30, %41 : vector<1x256xi1>, vector<1x256xf32>
    %c0_17 = arith.constant 0 : index
    %c0_18 = arith.constant 0 : index
    %c0_19 = arith.constant 0 : index
    %43 = vector.load %arg7[%c0_17, %c0_18, %c0_19] : memref<1x2x256xf32, #tpu.memory_space<vmem>>, vector<1x1x256xf32>
    %44 = arith.mulf %40, %42 : vector<1x256xf32>
    %45 = vector.shape_cast %44 : vector<1x256xf32> to vector<1x1x256xf32>
    %46 = arith.addf %43, %45 : vector<1x1x256xf32>
    %c0_20 = arith.constant 0 : index
    %c0_21 = arith.constant 0 : index
    %c0_22 = arith.constant 0 : index
    %47 = vector.load %arg7[%c0_20, %c0_21, %c0_22] : memref<1x2x256xf32, #tpu.memory_space<vmem>>, vector<1x1x256xf32>
    tpu.vector_store %arg7[%c0_20, %c0_21, %c0_22], %46 {strides = array<i32>} : memref<1x2x256xf32, #tpu.memory_space<vmem>>, vector<1x1x256xf32>,
    return
  }
  func.func @transform_0(%arg0: i32, %arg1: i32) -> (i32, i32) {
    %c1_i32 = arith.constant 1 : i32
    %0 = arith.muli %arg0, %c1_i32 : i32
    %1 = arith.addi %0, %arg1 : i32
    %c0_i32 = arith.constant 0 : i32
    %2 = arith.minsi %1, %c0_i32 : i32
    %c0_i32_0 = arith.constant 0 : i32
    %c0_i32_1 = arith.constant 0 : i32
    return %c0_i32_0, %2 : i32, i32
  }
  func.func @transform_1(%arg0: i32, %arg1: i32) -> (i32, i32) {
    %c1_i32 = arith.constant 1 : i32
    %0 = arith.muli %arg0, %c1_i32 : i32
    %1 = arith.addi %0, %arg1 : i32
    %c0_i32 = arith.constant 0 : i32
    %2 = arith.minsi %1, %c0_i32 : i32
    %c0_i32_0 = arith.constant 0 : i32
    %c0_i32_1 = arith.constant 0 : i32
    return %c0_i32_0, %2 : i32, i32
  }
  func.func @transform_2(%arg0: i32, %arg1: i32) -> (i32, i32) {
    %c0_i32 = arith.constant 0 : i32
    %c0_i32_0 = arith.constant 0 : i32
    %c0_i32_1 = arith.constant 0 : i32
    return %c0_i32, %c0_i32_0 : i32, i32
  }
  func.func @transform_3(%arg0: i32, %arg1: i32) -> (i32, i32) {
    %c0_i32 = arith.constant 0 : i32
    %c0_i32_0 = arith.constant 0 : i32
    %c0_i32_1 = arith.constant 0 : i32
    return %c0_i32, %c0_i32_0 : i32, i32
  }
  func.func @transform_4(%arg0: i32, %arg1: i32) -> (i32, i32) {
    %c0_i32 = arith.constant 0 : i32
    %c0_i32_0 = arith.constant 0 : i32
    %c0_i32_1 = arith.constant 0 : i32
    return %c0_i32, %c0_i32_0 : i32, i32
  }
  func.func @transform_5(%arg0: i32, %arg1: i32) -> (i32, i32, i32) {
    %c0_i32 = arith.constant 0 : i32
    %c0_i32_0 = arith.constant 0 : i32
    %c0_i32_1 = arith.constant 0 : i32
    return %arg0, %c0_i32, %c0_i32_0 : i32, i32, i32
  }
}

</mosaic_0001>

<bundles_post_ra>
// kernel: tpu_custom_call.1
= control target key start
LH: loop header
LB: loop body
LE: loop exit
PB: predicated region body
PF: predicated region fallthrough
CT: control target
= control target key end

     0   :  { %10 = vsyncpa [#allocation3], 0  ;;  %s353_s0 = inlined_call_operand.vmem [shape: f32[8,256], index: 0, kind: input, shape index: {}]   ;;  %s354_s1 = inlined_call_operand.hbm [shape: f32[8,256], index: 1, kind: input, shape index: {}]   ;;  %s355_s2 = inlined_call_operand.vmem [shape: f32[8,1], index: 2, kind: input, shape index: {}]   ;;  %s356_s3 = inlined_call_operand.vmem [shape: f32[8,1], index: 3, kind: input, shape index: {}]   ;;  %s357_s4 = inlined_call_operand.vmem [shape: f32[8,1], index: 4, kind: input, shape index: {}]   ;;  %s358_s5 = inlined_call_operand.hbm [shape: f32[1,2,256], index: 5, kind: output, shape index: {}]  }
   0x1   :  { %11 = vsyncpa [#allocation4], 0  ;;  %s279_s18 = smov [#allocation2]   ;;  %s231_s22 = scalar_lea.hbm %s354_s1, 256 }
   0x2   :  { %s38_s19 = sshll.u32 %s279_s18, 4  ;;  %p232_p0 = scmp.ne.s32.totalorder %s354_s1, %s231_s22  ;;  %s39_s19 = int_to_ptr.vmem [resolvable:$true] %s38_s19 }
   0x3   :  { %p235_p1 = scmp.lt.u32.totalorder %s231_s22, %s354_s1 }
   0x5   :  { %p237_p2 = pnand %p235_p1, %p232_p0 }
   0x7   :  { %240 = shalt.err (!%p237_p2)
}
   0x8   :  { %s241_s27 = scalar_lea.vmem %s39_s19, 256  ;;  %p246_p4 = scmp.lt.s32.totalorder %s39_s19, %s39_s19 }
   0x9   :  { %p242_p3 = scmp.ne.s32.totalorder %s39_s19, %s241_s27  ;;  %p247_p5 = scmp.lt.s32.totalorder %s241_s27, %s241_s27 }
   0xb   :  { %p248_p6 = por %p247_p5, %p246_p4 }
   0xd   :  { %p249_p7 = pnand %p248_p6, %p242_p3 }
   0xf   :  { %252 = shalt.err (!%p249_p7)
}
  0x10   :  { %41 = dma.hbm_to_vmem [thread:$0]  %s354_s1, 256, %s39_s19, [#allocation3]  }
  0x11   :  { %275 = dma.done.wait [#allocation3], 256  }
  0x12   :  { %276 = vsyncadd [#allocation3], 4294967040  ;;  %v280_v0 = vmov 0   ;;  %v89_v1 = vld [vmem:[%s356_s3] sm:$0xff]  ;;  %v281_v4 = vmov 0.0   ;;  %v81_v6 = vld [vmem:[%s353_s0 + $0x8] sm:$0xff]  ;;  %v175_v54 = vlaneseq }
  0x13   :  { %221 = vset.pattern.permute.xlu0 %v280_v0  ;;  %222 = vset.pattern.permute.xlu1 %v280_v0  ;;  %v90_v2 = vld [vmem:[%s357_s4] sm:$0xff]  ;;  %79 = vst [vmem:[#allocation5] sm:$0xf] %v281_v4  ;;  %v83_v8 = vmax.f32 %v81_v6, 1e-07  ;;  %v87_v18 = vld [vmem:[#allocation2 + $0x8] sm:$0xff] }
  0x14   :  { %103 = vperm.xlu0 %221, %v89_v1   ;;  %135 = vperm.xlu1 %222, %v90_v2   ;;  %v88_v3 = vld [vmem:[%s355_s2] sm:$0xff]  ;;  %v282_v52 = vmov 1966171168   ;;  %v176_v62 = vshrl.u32 %v175_v54, 7  ;;  %vm190_vm0 = vcmp.lt.s32.totalorder %v175_v54, 256 }
  0x15   :  { %v80_v5 = vld [vmem:[%s353_s0] sm:$0xff]  ;;  %v85_v10 = vmin.f32 %v83_v8, 0.9999999  ;;  %v173_v53 = vunpack.c.l.s4 %v282_v52  ;;  %s283_s0 = smov [#allocation5]  }
  0x16   :  { %v82_v7 = vmax.f32 %v80_v5, 1e-07  ;;  %v86_v17 = vld [vmem:[#allocation2] sm:$0xff]  ;;  %s199_s2 = sshll.u32 %s283_s0, 4  ;;  %s200_s2 = int_to_ptr.vmem [resolvable:$true] %s199_s2 }
  0x17   :  { %v96_v12 = vsub.f32 1.0, %v85_v10  ;;  %v174_v61 = vunpack.c.0.s8 %v173_v53  ;;  %s253_s3 = scalar_lea.vmem %s200_s2, 64  ;;  %p258_p9 = scmp.lt.s32.totalorder %s200_s2, %s200_s2 }
  0x18   :  { %110 = vperm.xlu0 %221, %v88_v3   ;;  %v84_v9 = vmin.f32 %v82_v7, 0.9999999  ;;  %p254_p8 = scmp.ne.s32.totalorder %s200_s2, %s253_s3  ;;  %p259_p10 = scmp.lt.s32.totalorder %s253_s3, %s253_s3 }
  0x19   :  { %v177_v5 = vsub.s32 %v174_v61, %v176_v62 }
  0x1a   :  { %v95_v11 = vsub.f32 1.0, %v84_v9  ;;  %223 = vlog2.f32 %v84_v9  ;;  %v166_v8 = vld [vmem:[#allocation5] ss:$2 sm:$0x3]  ;;  %p260_p11 = por %p259_p10, %p258_p9 }
  0x1b   :  { %225 = vlog2.f32 %v85_v10 }
  0x1c   :  { %227 = vlog2.f32 %v95_v11  ;;  %p261_p12 = pnand %p260_p11, %p254_p8 }
  0x1d   :  { %229 = vlog2.f32 %v96_v12 }
  0x24   :  { %v224_v13 = vpop.eup %223 }
  0x25   :  { %v226_v14 = vpop.eup %225  ;;  %v92_v20 = vmul.f32 0.6931472, %v224_v13 }
  0x26   :  { %v228_v15 = vpop.eup %227  ;;  %v94_v21 = vmul.f32 0.6931472, %v226_v14 }
  0x27   :  { %v230_v16 = vpop.eup %229  ;;  %v98_v25 = vmul.f32 0.6931472, %v228_v15 }
  0x28   :  { %v100_v26 = vmul.f32 0.6931472, %v230_v16 }
  0x93   :  { %v104_v19 = vpop.permute.xlu0 %103  ;;  %v136_v22 = vpop.permute.xlu1 %135 }
  0x94   :  { %v138_v23 = vmul.f32 %v136_v22, %v86_v17  ;;  %v139_v24 = vmul.f32 %v136_v22, %v87_v18  ;;  %v106_v30 = vmul.f32 %v104_v19, %v92_v20  ;;  %v107_v31 = vmul.f32 %v104_v19, %v94_v21 }
  0x96   :  { %v140_v27 = vrot.slane %v138_v23, 4  ;;  %v146_v28 = vrot.slane %v139_v24, 4 }
  0x97   :  { %v111_v29 = vpop.permute.xlu0 %110 }
  0x98   :  { %v113_v32 = vmul.f32 %v111_v29, %v98_v25  ;;  %v114_v33 = vmul.f32 %v111_v29, %v100_v26  ;;  %v141_v34 = vadd.f32 %v140_v27, %v138_v23  ;;  %v147_v35 = vadd.f32 %v146_v28, %v139_v24 }
  0x9a   :  { %v115_v36 = vsub.f32 %v106_v30, %v113_v32  ;;  %v116_v37 = vsub.f32 %v107_v31, %v114_v33  ;;  %v142_v40 = vrot.slane %v141_v34, 2  ;;  %v148_v41 = vrot.slane %v147_v35, 2 }
  0x9c   :  { %v117_v38 = vmul.f32 %v115_v36, %v86_v17  ;;  %v118_v39 = vmul.f32 %v116_v37, %v87_v18  ;;  %v143_v46 = vadd.f32 %v142_v40, %v141_v34  ;;  %v149_v47 = vadd.f32 %v148_v41, %v147_v35 }
  0x9e   :  { %v119_v42 = vadd.f32 %v117_v38, %v113_v32  ;;  %v120_v43 = vadd.f32 %v118_v39, %v114_v33  ;;  %v144_v55 = vrot.slane %v143_v46, 1  ;;  %v150_v56 = vrot.slane %v149_v47, 1 }
  0xa0   :  { %v121_v44 = vrot.slane %v119_v42, 4  ;;  %v127_v45 = vrot.slane %v120_v43, 4  ;;  %v145_v63 = vadd.f32 %v144_v55, %v143_v46  ;;  %v151_v0 = vadd.f32 %v150_v56, %v149_v47 }
  0xa2   :  { %v122_v48 = vadd.f32 %v121_v44, %v119_v42  ;;  %v128_v49 = vadd.f32 %v127_v45, %v120_v43 }
  0xa4   :  { %v123_v50 = vrot.slane %v122_v48, 2  ;;  %v129_v51 = vrot.slane %v128_v49, 2 }
  0xa6   :  { %v124_v57 = vadd.f32 %v123_v50, %v122_v48  ;;  %v130_v58 = vadd.f32 %v129_v51, %v128_v49 }
  0xa8   :  { %v125_v59 = vrot.slane %v124_v57, 1  ;;  %v131_v60 = vrot.slane %v130_v58, 1 }
  0xaa   :  { %v126_v1 = vadd.f32 %v125_v59, %v124_v57  ;;  %v132_v2 = vadd.f32 %v131_v60, %v130_v58 }
  0xac   :  { %v167_v3 = vmul.f32 %v145_v63, %v126_v1  ;;  %v168_v4 = vmul.f32 %v151_v0, %v132_v2 }
  0xae   :  { %v171_v6 = vcombine.low %v167_v3, %v168_v4 }
  0xb0   :  { %v178_v7 = vrot.slane %v171_v6, %v177_v5 }
  0xb2   :  { %v185_v9 = vrot.slane %v178_v7, %v177_v5 }
  0xb4   :  { %v187_v10 = vadd.f32 %v185_v9, %v166_v8 }
  0xb6   :  { %192 = vst.msk [vmem:[#allocation5] ss:$2 sm:$0x3] %vm190_vm0, %v187_v10 }
  0xb7   :  { %264 = shalt.err (!%p261_p12)
}
  0xb8   :  { %s265_s15 = scalar_lea.hbm %s358_s5, 64 }
  0xb9   :  { %p266_p13 = scmp.ne.s32.totalorder %s358_s5, %s265_s15  ;;  %p269_p0 = scmp.lt.u32.totalorder %s265_s15, %s358_s5 }
  0xbb   :  { %p271_p1 = pnand %p269_p0, %p266_p13 }
  0xbd   :  { %274 = shalt.err (!%p271_p1)
}
  0xbe   :  { %202 = dma.vmem_to_hbm [thread:$0]  %s200_s2, 64, %s358_s5, [#allocation4]  }
  0xbf   :  { %277 = dma.done.wait [#allocation4], 64  }
  0xc0   :  { %278 = vsyncadd [#allocation4], 4294967232 }
  0xc1   :  { %206 = vsyncpa [#allocation3], 1 }
  0xc2   :  { %207 = vsyncpa [#allocation4], 1 }

</bundles_post_ra>
